<compile_context>
chip_gen: v6e
topology: v6e:2x2x1
jax: 0.10.0
libtpu: 0.0.40
codegen_flags: <defaults>
</compile_context>

<pallas_src>
import functools

import jax
import jax.numpy as jnp
from jax.experimental import pallas as pl
from jax.experimental.pallas import tpu as pltpu


REPARAM_NOISE = 1e-6
HEAD_PAD = 128          # lane-dense fused-head output width (multiple of 128)
TILE_B_CAP = 512        # max batch tile (multiple of 8)


def _round_up(x, m):
    return ((x + m - 1) // m) * m


def _pick_tile_b(B, cap=TILE_B_CAP):
    """Adaptive batch tile.

    Small B (action selection): one tile of round_up(B, 8) rows -> no padded-row
    waste. Large B (training): big tiles amortize the ~0.35us/step pipeline
    overhead, but keep >= 2 grid steps so v7x megacore gets both cores busy.
    """
    b8 = _round_up(max(int(B), 1), 8)
    if b8 <= 256:
        return b8
    return min(cap, _round_up((b8 + 1) // 2, 8))


def _actor_kernel(compute_dtype, x_ref, w1_ref, b1_ref, w2_ref, b2_ref,
                  whead_ref, bhead_ref, lo_ref, hi_ref, out_ref):
    """One batch tile of the full forward pass (weights VMEM-resident)."""
    x = x_ref[...].astype(compute_dtype)

    # fc1 + ReLU   (K = D is tiny; single MXU pass, no K tiling on purpose)
    h1 = jnp.dot(x, w1_ref[...], preferred_element_type=jnp.float32)
    h1 = jnp.maximum(h1 + b1_ref[...], 0.0)

    # fc2 + ReLU
    h2 = jnp.dot(h1.astype(compute_dtype), w2_ref[...],
                 preferred_element_type=jnp.float32)
    h2 = jnp.maximum(h2 + b2_ref[...], 0.0)

    # fused mu||sigma head, lane-padded to HEAD_PAD columns
    head = jnp.dot(h2.astype(compute_dtype), whead_ref[...],
                   preferred_element_type=jnp.float32)
    head = head + bhead_ref[...]

    # per-column clamp: lo = 1e-6 / hi = 1 on sigma columns, +-inf elsewhere
    out_ref[...] = jnp.minimum(jnp.maximum(head, lo_ref[...]),
                               hi_ref[...]).astype(out_ref.dtype)


def prepare_actor_params(params, use_bf16=False):
    """One-time prep (hoisted out of the forward path).

    Fuses the mu/sigma heads into a single lane-padded [H2, 128] weight/bias,
    builds the per-column clamp lo/hi vectors, and optionally casts the matmul
    weights to bf16 (biases / epilogue stay f32). Returns (prepped, n_actions).
    """
    n_actions = params["wmu"].shape[1]
    assert 2 * n_actions <= HEAD_PAD
    H2 = params["w2"].shape[1]
    wdtype = jnp.bfloat16 if use_bf16 else jnp.float32

    whead = jnp.zeros((H2, HEAD_PAD), jnp.float32)
    whead = whead.at[:, :n_actions].set(params["wmu"])
    whead = whead.at[:, n_actions:2 * n_actions].set(params["wsig"])
    bhead = jnp.zeros((1, HEAD_PAD), jnp.float32)
    bhead = bhead.at[:, :n_actions].set(params["bmu"])
    bhead = bhead.at[:, n_actions:2 * n_actions].set(params["bsig"])

    lo = jnp.full((1, HEAD_PAD), -jnp.inf, jnp.float32)
    lo = lo.at[:, n_actions:2 * n_actions].set(REPARAM_NOISE)
    hi = jnp.full((1, HEAD_PAD), jnp.inf, jnp.float32)
    hi = hi.at[:, n_actions:2 * n_actions].set(1.0)

    prepped = {
        "w1": params["w1"].astype(wdtype),
        "b1": params["b1"].astype(jnp.float32),
        "w2": params["w2"].astype(wdtype),
        "b2": params["b2"].astype(jnp.float32),
        "whead": whead.astype(wdtype),
        "bhead": bhead,
        "lo": lo,
        "hi": hi,
    }
    return prepped, n_actions


@functools.partial(jax.jit, static_argnames=("n_actions",))
def actor_forward(state, prepped, *, n_actions):
    """Pallas-backed equivalent of ActorNetwork.forward.

    Args:
      state:   [B, D] float32
      prepped: output of prepare_actor_params
      n_actions: static int
    Returns:
      (mu, sigma): each [B, n_actions] float32
    """
    B, D = state.shape
    H1 = prepped["w1"].shape[1]
    H2 = prepped["w2"].shape[1]
    compute_dtype = prepped["w1"].dtype
    wbytes = jnp.dtype(compute_dtype).itemsize

    tile_b = _pick_tile_b(B)
    num_tiles = pl.cdiv(B, tile_b)
    b_eff = num_tiles * tile_b

    flops = 2 * b_eff * (D * H1 + H1 * H2 + H2 * HEAD_PAD)
    bytes_accessed = (4 * B * D                                   # state
                      + wbytes * (D * H1 + H1 * H2 + H2 * HEAD_PAD)  # weights
                      + 4 * (H1 + H2 + 3 * HEAD_PAD)              # biases+lo/hi
                      + 4 * B * HEAD_PAD)                         # out slab

    out = pl.pallas_call(
        functools.partial(_actor_kernel, compute_dtype),
        out_shape=jax.ShapeDtypeStruct((B, HEAD_PAD), jnp.float32),
        grid_spec=pltpu.PrefetchScalarGridSpec(
            num_scalar_prefetch=0,
            grid=(num_tiles,),
            in_specs=[
                pl.BlockSpec((tile_b, D), lambda i: (i, 0)),      # state tile
                pl.BlockSpec((D, H1), lambda i: (0, 0)),          # W1 (resident)
                pl.BlockSpec((1, H1), lambda i: (0, 0)),          # b1
                pl.BlockSpec((H1, H2), lambda i: (0, 0)),         # W2
                pl.BlockSpec((1, H2), lambda i: (0, 0)),          # b2
                pl.BlockSpec((H2, HEAD_PAD), lambda i: (0, 0)),   # fused head W
                pl.BlockSpec((1, HEAD_PAD), lambda i: (0, 0)),    # fused head b
                pl.BlockSpec((1, HEAD_PAD), lambda i: (0, 0)),    # clamp lo
                pl.BlockSpec((1, HEAD_PAD), lambda i: (0, 0)),    # clamp hi
            ],
            out_specs=pl.BlockSpec((tile_b, HEAD_PAD), lambda i: (i, 0)),
        ),
        compiler_params=pltpu.CompilerParams(
            dimension_semantics=("parallel",)),
        cost_estimate=pl.CostEstimate(flops=flops, transcendentals=0,
                                      bytes_accessed=bytes_accessed),
    )(state, prepped["w1"], prepped["b1"], prepped["w2"], prepped["b2"],
      prepped["whead"], prepped["bhead"], prepped["lo"], prepped["hi"])

    mu = out[:, :n_actions]
    sigma = out[:, n_actions:2 * n_actions]
    return mu, sigma


def init_actor_params(key, input_dim, fc1_dims=256, fc2_dims=256, n_actions=2):
    """Deterministic init mimicking nn.Linear's U(-1/sqrt(fan_in), +1/sqrt(fan_in)).

    Weights stored [in, out]; biases as (1, out) for TPU-friendly layout.
    """
    def linear(k, fan_in, fan_out):
        kw, kb = jax.random.split(k)
        bound = 1.0 / jnp.sqrt(fan_in)
        w = jax.random.uniform(kw, (fan_in, fan_out), jnp.float32, -bound, bound)
        b = jax.random.uniform(kb, (1, fan_out), jnp.float32, -bound, bound)
        return w, b

    k1, k2, k3, k4 = jax.random.split(key, 4)
    w1, b1 = linear(k1, input_dim, fc1_dims)
    w2, b2 = linear(k2, fc1_dims, fc2_dims)
    wmu, bmu = linear(k3, fc2_dims, n_actions)
    wsig, bsig = linear(k4, fc2_dims, n_actions)
    return {"w1": w1, "b1": b1, "w2": w2, "b2": b2,
            "wmu": wmu, "bmu": bmu, "wsig": wsig, "bsig": bsig}


def _reference_forward(state, params):
    h1 = jnp.maximum(state @ params["w1"] + params["b1"], 0.0)
    h2 = jnp.maximum(h1 @ params["w2"] + params["b2"], 0.0)
    mu = h2 @ params["wmu"] + params["bmu"]
    sigma = jnp.clip(h2 @ params["wsig"] + params["bsig"], REPARAM_NOISE, 1.0)
    return mu, sigma


if __name__ == "__main__":
    key = jax.random.PRNGKey(0)
    k_params, k_state, k_state_big = jax.random.split(key, 3)

    B, D = 4, 8            # small batch, input_dims=(8,)
    n_actions = 2

    params = init_actor_params(k_params, input_dim=D, n_actions=n_actions)
    state = jax.random.normal(k_state, (B, D), jnp.float32)
    sigma_lo = float(jnp.float32(REPARAM_NOISE))

    # ---- f32 path (exact numerics vs reference), small batch -------------
    prepped_f32, n_act = prepare_actor_params(params, use_bf16=False)
    mu, sigma = actor_forward(state, prepped_f32, n_actions=n_act)
    jax.block_until_ready((mu, sigma))

    mu_ref, sigma_ref = _reference_forward(state, params)
    assert mu.shape == (B, n_actions) and sigma.shape == (B, n_actions)
    assert jnp.allclose(mu, mu_ref, atol=1e-5, rtol=1e-5)
    assert jnp.allclose(sigma, sigma_ref, atol=1e-5, rtol=1e-5)
    assert float(sigma.min()) >= sigma_lo and float(sigma.max()) <= 1.0

    # ---- f32 path, multi-tile grid with ragged last tile ------------------
    B_big = 300
    state_big = jax.random.normal(k_state_big, (B_big, D), jnp.float32)
    mu_b, sigma_b = actor_forward(state_big, prepped_f32, n_actions=n_act)
    jax.block_until_ready((mu_b, sigma_b))
    mu_ref_b, sigma_ref_b = _reference_forward(state_big, params)
    assert mu_b.shape == (B_big, n_actions)
    assert jnp.allclose(mu_b, mu_ref_b, atol=1e-5, rtol=1e-5)
    assert jnp.allclose(sigma_b, sigma_ref_b, atol=1e-5, rtol=1e-5)

    # ---- bf16-MXU path (f32 accumulate + f32 epilogue), loose tolerance ---
    prepped_bf16, _ = prepare_actor_params(params, use_bf16=True)
    mu16, sigma16 = actor_forward(state, prepped_bf16, n_actions=n_act)
    jax.block_until_ready((mu16, sigma16))
    assert jnp.allclose(mu16, mu_ref, atol=5e-2, rtol=5e-2)
    assert jnp.allclose(sigma16, sigma_ref, atol=5e-2, rtol=5e-2)
    assert float(sigma16.min()) >= sigma_lo and float(sigma16.max()) <= 1.0

    # TODO(synk): sample_normal (Normal rsample / tanh squash / log_prob) is a
    # host-side sampling utility, not part of forward(); left out of the kernel.
    print("KERNEL_OK")
</pallas_src>

<mosaic_0001>
module attributes {stable_mosaic.version = 11 : i64} {
  func.func @_actor_kernel(%arg0: i32, %arg1: memref<8x8xf32, #tpu.memory_space<vmem>>, %arg2: memref<8x256xf32, #tpu.memory_space<vmem>>, %arg3: memref<1x256xf32, #tpu.memory_space<vmem>>, %arg4: memref<256x256xf32, #tpu.memory_space<vmem>>, %arg5: memref<1x256xf32, #tpu.memory_space<vmem>>, %arg6: memref<256x128xf32, #tpu.memory_space<vmem>>, %arg7: memref<1x128xf32, #tpu.memory_space<vmem>>, %arg8: memref<1x128xf32, #tpu.memory_space<vmem>>, %arg9: memref<1x128xf32, #tpu.memory_space<vmem>>, %arg10: memref<8x128xf32, #tpu.memory_space<vmem>>) attributes {dimension_semantics = [#tpu.dimension_semantics<parallel>], iteration_bounds = array<i64: 1>, scalar_prefetch = 0 : i64, scratch_operands = 0 : i64, tpu.core_type = #tpu.core_type<tc>, window_params = [{transform_indices = @transform_0, window_bounds = array<i64: 8, 8>}, {pipeline_mode = #tpu.pipeline_mode<synchronous>, transform_indices = @transform_1, window_bounds = array<i64: 8, 256>}, {pipeline_mode = #tpu.pipeline_mode<synchronous>, transform_indices = @transform_2, window_bounds = array<i64: 1, 256>}, {pipeline_mode = #tpu.pipeline_mode<synchronous>, transform_indices = @transform_3, window_bounds = array<i64: 256, 256>}, {pipeline_mode = #tpu.pipeline_mode<synchronous>, transform_indices = @transform_4, window_bounds = array<i64: 1, 256>}, {pipeline_mode = #tpu.pipeline_mode<synchronous>, transform_indices = @transform_5, window_bounds = array<i64: 256, 128>}, {pipeline_mode = #tpu.pipeline_mode<synchronous>, transform_indices = @transform_6, window_bounds = array<i64: 1, 128>}, {pipeline_mode = #tpu.pipeline_mode<synchronous>, transform_indices = @transform_7, window_bounds = array<i64: 1, 128>}, {pipeline_mode = #tpu.pipeline_mode<synchronous>, transform_indices = @transform_8, window_bounds = array<i64: 1, 128>}, {transform_indices = @transform_9, window_bounds = array<i64: 8, 128>}]} {
    %c0 = arith.constant 0 : index
    %c0_0 = arith.constant 0 : index
    %0 = vector.load %arg1[%c0, %c0_0] : memref<8x8xf32, #tpu.memory_space<vmem>>, vector<8x8xf32>
    %c0_1 = arith.constant 0 : index
    %c0_2 = arith.constant 0 : index
    %1 = vector.load %arg2[%c0_1, %c0_2] : memref<8x256xf32, #tpu.memory_space<vmem>>, vector<8x256xf32>
    %cst = arith.constant dense<0.000000e+00> : vector<8x256xf32>
    %2 = tpu.matmul %0, %1, %cst {dimension_numbers = #tpu.dot_dimension_numbers<[1], [0], [0], [1], [0, 0, 1, 1], [], []>} : vector<8x8xf32>, vector<8x256xf32>, vector<8x256xf32> -> vector<8x256xf32>
    %c0_3 = arith.constant 0 : index
    %c0_4 = arith.constant 0 : index
    %3 = vector.load %arg3[%c0_3, %c0_4] : memref<1x256xf32, #tpu.memory_space<vmem>>, vector<1x256xf32>
    %4 = vector.broadcast %3 : vector<1x256xf32> to vector<8x256xf32>
    %5 = arith.addf %2, %4 : vector<8x256xf32>
    %cst_5 = arith.constant 0.000000e+00 : f32
    %6 = vector.broadcast %cst_5 : f32 to vector<8x256xf32>
    %7 = arith.maximumf %5, %6 : vector<8x256xf32>
    %c0_6 = arith.constant 0 : index
    %c0_7 = arith.constant 0 : index
    %8 = vector.load %arg4[%c0_6, %c0_7] : memref<256x256xf32, #tpu.memory_space<vmem>>, vector<256x256xf32>
    %cst_8 = arith.constant dense<0.000000e+00> : vector<8x256xf32>
    %9 = tpu.matmul %7, %8, %cst_8 {dimension_numbers = #tpu.dot_dimension_numbers<[1], [0], [0], [1], [0, 0, 1, 1], [], []>} : vector<8x256xf32>, vector<256x256xf32>, vector<8x256xf32> -> vector<8x256xf32>
    %c0_9 = arith.constant 0 : index
    %c0_10 = arith.constant 0 : index
    %10 = vector.load %arg5[%c0_9, %c0_10] : memref<1x256xf32, #tpu.memory_space<vmem>>, vector<1x256xf32>
    %11 = vector.broadcast %10 : vector<1x256xf32> to vector<8x256xf32>
    %12 = arith.addf %9, %11 : vector<8x256xf32>
    %cst_11 = arith.constant 0.000000e+00 : f32
    %13 = vector.broadcast %cst_11 : f32 to vector<8x256xf32>
    %14 = arith.maximumf %12, %13 : vector<8x256xf32>
    %c0_12 = arith.constant 0 : index
    %c0_13 = arith.constant 0 : index
    %15 = vector.load %arg6[%c0_12, %c0_13] : memref<256x128xf32, #tpu.memory_space<vmem>>, vector<256x128xf32>
    %cst_14 = arith.constant dense<0.000000e+00> : vector<8x128xf32>
    %16 = tpu.matmul %14, %15, %cst_14 {dimension_numbers = #tpu.dot_dimension_numbers<[1], [0], [0], [1], [0, 0, 1, 1], [], []>} : vector<8x256xf32>, vector<256x128xf32>, vector<8x128xf32> -> vector<8x128xf32>
    %c0_15 = arith.constant 0 : index
    %c0_16 = arith.constant 0 : index
    %17 = vector.load %arg7[%c0_15, %c0_16] : memref<1x128xf32, #tpu.memory_space<vmem>>, vector<1x128xf32>
    %18 = vector.broadcast %17 : vector<1x128xf32> to vector<8x128xf32>
    %19 = arith.addf %16, %18 : vector<8x128xf32>
    %c0_17 = arith.constant 0 : index
    %c0_18 = arith.constant 0 : index
    %20 = vector.load %arg8[%c0_17, %c0_18] : memref<1x128xf32, #tpu.memory_space<vmem>>, vector<1x128xf32>
    %21 = vector.broadcast %20 : vector<1x128xf32> to vector<8x128xf32>
    %22 = arith.maximumf %19, %21 : vector<8x128xf32>
    %c0_19 = arith.constant 0 : index
    %c0_20 = arith.constant 0 : index
    %23 = vector.load %arg9[%c0_19, %c0_20] : memref<1x128xf32, #tpu.memory_space<vmem>>, vector<1x128xf32>
    %24 = vector.broadcast %23 : vector<1x128xf32> to vector<8x128xf32>
    %25 = arith.minimumf %22, %24 : vector<8x128xf32>
    %c0_21 = arith.constant 0 : index
    %c0_22 = arith.constant 0 : index
    %26 = vector.load %arg10[%c0_21, %c0_22] : memref<8x128xf32, #tpu.memory_space<vmem>>, vector<8x128xf32>
    tpu.vector_store %arg10[%c0_21, %c0_22], %25 {strides = array<i32>} : memref<8x128xf32, #tpu.memory_space<vmem>>, vector<8x128xf32>,
    return
  }
  func.func @transform_0(%arg0: i32) -> (i32, i32) {
    %c0_i32 = arith.constant 0 : i32
    %c0_i32_0 = arith.constant 0 : i32
    return %arg0, %c0_i32 : i32, i32
  }
  func.func @transform_1(%arg0: i32) -> (i32, i32) {
    %c0_i32 = arith.constant 0 : i32
    %c0_i32_0 = arith.constant 0 : i32
    %c0_i32_1 = arith.constant 0 : i32
    return %c0_i32, %c0_i32_0 : i32, i32
  }
  func.func @transform_2(%arg0: i32) -> (i32, i32) {
    %c0_i32 = arith.constant 0 : i32
    %c0_i32_0 = arith.constant 0 : i32
    %c0_i32_1 = arith.constant 0 : i32
    return %c0_i32, %c0_i32_0 : i32, i32
  }
  func.func @transform_3(%arg0: i32) -> (i32, i32) {
    %c0_i32 = arith.constant 0 : i32
    %c0_i32_0 = arith.constant 0 : i32
    %c0_i32_1 = arith.constant 0 : i32
    return %c0_i32, %c0_i32_0 : i32, i32
  }
  func.func @transform_4(%arg0: i32) -> (i32, i32) {
    %c0_i32 = arith.constant 0 : i32
    %c0_i32_0 = arith.constant 0 : i32
    %c0_i32_1 = arith.constant 0 : i32
    return %c0_i32, %c0_i32_0 : i32, i32
  }
  func.func @transform_5(%arg0: i32) -> (i32, i32) {
    %c0_i32 = arith.constant 0 : i32
    %c0_i32_0 = arith.constant 0 : i32
    %c0_i32_1 = arith.constant 0 : i32
    return %c0_i32, %c0_i32_0 : i32, i32
  }
  func.func @transform_6(%arg0: i32) -> (i32, i32) {
    %c0_i32 = arith.constant 0 : i32
    %c0_i32_0 = arith.constant 0 : i32
    %c0_i32_1 = arith.constant 0 : i32
    return %c0_i32, %c0_i32_0 : i32, i32
  }
  func.func @transform_7(%arg0: i32) -> (i32, i32) {
    %c0_i32 = arith.constant 0 : i32
    %c0_i32_0 = arith.constant 0 : i32
    %c0_i32_1 = arith.constant 0 : i32
    return %c0_i32, %c0_i32_0 : i32, i32
  }
  func.func @transform_8(%arg0: i32) -> (i32, i32) {
    %c0_i32 = arith.constant 0 : i32
    %c0_i32_0 = arith.constant 0 : i32
    %c0_i32_1 = arith.constant 0 : i32
    return %c0_i32, %c0_i32_0 : i32, i32
  }
  func.func @transform_9(%arg0: i32) -> (i32, i32) {
    %c0_i32 = arith.constant 0 : i32
    %c0_i32_0 = arith.constant 0 : i32
    return %arg0, %c0_i32 : i32, i32
  }
}

</mosaic_0001>

<bundles_post_ra>
// kernel: actor_forward.1
= control target key start
LH: loop header
LB: loop body
LE: loop exit
PB: predicated region body
PF: predicated region fallthrough
CT: control target
= control target key end

     0   :  { %14 = vsyncpa [#allocation3], 0  ;;  %s756_s0 = inlined_call_operand.hbm [shape: f32[4,8], index: 0, kind: input, shape index: {}]   ;;  %s757_s1 = inlined_call_operand.hbm [shape: f32[8,256], index: 1, kind: input, shape index: {}]   ;;  %s758_s2 = inlined_call_operand.hbm [shape: f32[1,256], index: 2, kind: input, shape index: {}]   ;;  %s759_s3 = inlined_call_operand.hbm [shape: f32[256,256], index: 3, kind: input, shape index: {}]   ;;  %s760_s4 = inlined_call_operand.vmem [shape: f32[1,256], index: 4, kind: input, shape index: {}]   ;;  %s761_s5 = inlined_call_operand.hbm [shape: f32[256,128], index: 5, kind: input, shape index: {}]   ;;  %s762_s6 = inlined_call_operand.vmem [shape: f32[1,128], index: 6, kind: input, shape index: {}]   ;;  %s763_s7 = inlined_call_operand.vmem [shape: f32[1,128], index: 7, kind: input, shape index: {}]   ;;  %s764_s8 = inlined_call_operand.vmem [shape: f32[1,128], index: 8, kind: input, shape index: {}]   ;;  %s765_s9 = inlined_call_operand.vmem [shape: f32[4,128], index: 9, kind: output, shape index: {}]  }
   0x1   :  { %15 = vsyncpa [#allocation5], 0 }
   0x2   :  { %16 = vsyncpa [#allocation8], 0 }
   0x3   :  { %21 = vsyncadd [#allocation3], 64  ;;  %s664_s30 = smov [#allocation4]   ;;  %s665_s11 = smov [#allocation7]  }
   0x4   :  { %s35_s10 = sshll.u32 %s664_s30, 4  ;;  %s54_s12 = sshll.u32 %s665_s11, 4  ;;  %s36_s10 = int_to_ptr.vmem [resolvable:$true] %s35_s10  ;;  %s55_s12 = int_to_ptr.vmem [resolvable:$true] %s54_s12 }
   0x5   :  { %s566_s13 = scalar_lea.vmem %s36_s10, 256  ;;  %p571_p1 = scmp.lt.s32.totalorder %s36_s10, %s36_s10 }
   0x6   :  { %p567_p0 = scmp.ne.s32.totalorder %s36_s10, %s566_s13  ;;  %p572_p2 = scmp.lt.s32.totalorder %s566_s13, %s566_s13 }
   0x8   :  { %p573_p3 = por %p572_p2, %p571_p1 }
   0xa   :  { %p574_p4 = pnand %p573_p3, %p567_p0 }
   0xc   :  { %577 = shalt.err (!%p574_p4)
}
   0xd   :  { %38 = dma.hbm_to_vmem [thread:$0]  %s757_s1, 256, %s36_s10, [#allocation5]  }
   0xe   :  { %s586_s16 = scalar_lea.vmem %s55_s12, 8192  ;;  %p591_p6 = scmp.lt.s32.totalorder %s55_s12, %s55_s12 }
   0xf   :  { %p587_p5 = scmp.ne.s32.totalorder %s55_s12, %s586_s16  ;;  %p592_p7 = scmp.lt.s32.totalorder %s586_s16, %s586_s16 }
  0x11   :  { %p593_p8 = por %p592_p7, %p591_p6 }
  0x13   :  { %p594_p9 = pnand %p593_p8, %p587_p5 }
  0x15   :  { %597 = shalt.err (!%p594_p9)
}
  0x16   :  { %s666_s17 = smov 256   ;;  %s667_s18 = smov 16  }
  0x17   :  { %60 = dma.hbm_to_vmem [thread:$0]  %s759_s3, 8192, %s55_s12, [#allocation8], %s666_s17, %s666_s17, %s667_s18  }
  0x18   :  { %s668_s21 = smov [#allocation2]  }
  0x19   :  { %s22_s22 = sshll.u32 %s668_s21, 4  ;;  %s23_s22 = int_to_ptr.vmem [resolvable:$true] %s22_s22 }
  0x1a   :  { %s606_s23 = scalar_lea.vmem %s23_s22, 64  ;;  %s610_s24 = scalar_lea.vmem %s23_s22, 128 }
  0x1b   :  { %p607_p10 = scmp.ne.s32.totalorder %s23_s22, %s606_s23  ;;  %p611_p11 = scmp.lt.s32.totalorder %s23_s22, %s23_s22 }
  0x1c   :  { %p612_p12 = scmp.lt.s32.totalorder %s610_s24, %s606_s23 }
  0x1e   :  { %p613_p13 = por %p612_p12, %p611_p11 }
  0x20   :  { %p614_p0 = pnand %p613_p13, %p607_p10 }
  0x22   :  { %617 = shalt.err (!%p614_p0)
}
  0x23   :  { %s669_s1 = smov 64   ;;  %s670_s25 = smov 4  }
  0x24   :  { %28 = dma.hbm_to_vmem [thread:$0]  %s756_s0, 64, %s23_s22, [#allocation3], %s669_s1, %s669_s1, %s670_s25  }
  0x25   :  { %s671_s28 = smov [#allocation6]   ;;  %s672_s3 = smov [#allocation9]  }
  0x26   :  { %s45_s29 = sshll.u32 %s671_s28, 4  ;;  %s68_s30 = sshll.u32 %s672_s3, 4  ;;  %s46_s29 = int_to_ptr.vmem [resolvable:$true] %s45_s29  ;;  %s69_s30 = int_to_ptr.vmem [resolvable:$true] %s68_s30 }
  0x27   :  { %s626_s10 = scalar_lea.vmem %s46_s29, 32  ;;  %p631_p2 = scmp.lt.s32.totalorder %s46_s29, %s46_s29 }
  0x28   :  { %p627_p1 = scmp.ne.s32.totalorder %s46_s29, %s626_s10  ;;  %p632_p3 = scmp.lt.s32.totalorder %s626_s10, %s626_s10 }
  0x2a   :  { %p633_p4 = por %p632_p3, %p631_p2 }
  0x2c   :  { %p634_p5 = pnand %p633_p4, %p627_p1 }
  0x2e   :  { %637 = shalt.err (!%p634_p5)
}
  0x2f   :  { %48 = dma.hbm_to_vmem [thread:$0]  %s758_s2, 32, %s46_s29, [#allocation5]  }
  0x30   :  { %s646_s13 = scalar_lea.vmem %s69_s30, 4096  ;;  %p651_p7 = scmp.lt.s32.totalorder %s69_s30, %s69_s30 }
  0x31   :  { %p647_p6 = scmp.ne.s32.totalorder %s69_s30, %s646_s13  ;;  %p652_p8 = scmp.lt.s32.totalorder %s646_s13, %s646_s13 }
  0x33   :  { %p653_p9 = por %p652_p8, %p651_p7 }
  0x35   :  { %p654_p10 = pnand %p653_p9, %p647_p6 }
  0x37   :  { %657 = shalt.err (!%p654_p10)
}
  0x38   :  { %s673_s0 = smov 128   ;;  %s674_s14 = smov 8  }
  0x39   :  { %74 = dma.hbm_to_vmem [thread:$0]  %s761_s5, 4096, %s69_s30, [#allocation8], %s673_s0, %s673_s0, %s674_s14  }
  0x3a   :  { %658 = dma.done.wait [#allocation3], 128  }
  0x3b   :  { %659 = vsyncadd [#allocation3], 4294967168 }
  0x3c   :  { %660 = dma.done.wait [#allocation5], 288  }
  0x3d   :  { %661 = vsyncadd [#allocation5], 4294967008 }
  0x3e   :  { %662 = dma.done.wait [#allocation8], 12288  }
  0x3f   :  { %663 = vsyncadd [#allocation8], 4294955008  ;;  %v675_v0 = vmov 0.0   ;;  %v98_v1 = vld [vmem:[#allocation4 + $0x8] sm:$0xff]  ;;  %v97_v2 = vld [vmem:[#allocation4] sm:$0xff]  ;;  %vm111_vm0 = vcmask 64512  }
  0x40   :  { %179 = vmatprep.mubr.f32.mxu0 %v675_v0  ;;  %v96_v3 = vld [vmem:[#allocation2] sm:$0xff]  ;;  %145 = vmatprep.subr.mxu0 %v98_v1  ;;  %v219_v4 = vld [vmem:[#allocation7 + $0xf8] sm:$0xff]  ;;  %v218_v5 = vld [vmem:[#allocation7 + $0xf0] sm:$0xff] }
  0x41   :  { %v217_v6 = vld [vmem:[#allocation7 + $0xe8] sm:$0xff]  ;;  %146 = vmatpush1.msra.mxu0 %v97_v2  ;;  %264 = vmatprep.subr.mxu1 %v219_v4  ;;  %v216_v7 = vld [vmem:[#allocation7 + $0xe0] sm:$0xff]  ;;  %v215_v8 = vld [vmem:[#allocation7 + $0xd8] sm:$0xff] }
  0x42   :  { %507 = vmatmul.mubr.msk.f32.vlgmr.msra.gmra.mxu0 %vm111_vm0, %v96_v3  ;;  %265 = vmatpush1.msra.mxu1 %v218_v5  ;;  %v214_v9 = vld [vmem:[#allocation7 + $0xd0] sm:$0xff]  ;;  %v213_v10 = vld [vmem:[#allocation7 + $0xc8] sm:$0xff]  ;;  %v212_v11 = vld [vmem:[#allocation7 + $0xc0] sm:$0xff] }
  0x43   :  { %266 = vmatprep.subr.mxu1 %v217_v6  ;;  %v211_v12 = vld [vmem:[#allocation7 + $0xb8] sm:$0xff]  ;;  %v210_v13 = vld [vmem:[#allocation7 + $0xb0] sm:$0xff]  ;;  %v209_v14 = vld [vmem:[#allocation7 + $0xa8] sm:$0xff] }
  0x44   :  { %267 = vmatpush1.msra.mxu1 %v216_v7  ;;  %v208_v15 = vld [vmem:[#allocation7 + $0xa0] sm:$0xff]  ;;  %v207_v16 = vld [vmem:[#allocation7 + $0x98] sm:$0xff]  ;;  %v206_v17 = vld [vmem:[#allocation7 + $0x90] sm:$0xff] }
  0x45   :  { %268 = vmatprep.subr.mxu1 %v215_v8  ;;  %v205_v18 = vld [vmem:[#allocation7 + $0x88] sm:$0xff]  ;;  %v204_v19 = vld [vmem:[#allocation7 + $0x80] sm:$0xff]  ;;  %v203_v20 = vld [vmem:[#allocation7 + $0x78] sm:$0xff] }
  0x46   :  { %269 = vmatpush1.msra.mxu1 %v214_v9  ;;  %v202_v21 = vld [vmem:[#allocation7 + $0x70] sm:$0xff]  ;;  %v201_v22 = vld [vmem:[#allocation7 + $0x68] sm:$0xff]  ;;  %v200_v23 = vld [vmem:[#allocation7 + $0x60] sm:$0xff] }
  0x47   :  { %270 = vmatprep.subr.mxu1 %v213_v10  ;;  %v199_v24 = vld [vmem:[#allocation7 + $0x58] sm:$0xff]  ;;  %v198_v25 = vld [vmem:[#allocation7 + $0x50] sm:$0xff]  ;;  %v197_v26 = vld [vmem:[#allocation7 + $0x48] sm:$0xff] }
  0x48   :  { %271 = vmatpush1.msra.mxu1 %v212_v11  ;;  %v196_v27 = vld [vmem:[#allocation7 + $0x40] sm:$0xff]  ;;  %v195_v28 = vld [vmem:[#allocation7 + $0x38] sm:$0xff]  ;;  %v194_v29 = vld [vmem:[#allocation7 + $0x30] sm:$0xff] }
  0x49   :  { %272 = vmatprep.subr.mxu1 %v211_v12  ;;  %v193_v30 = vld [vmem:[#allocation7 + $0x28] sm:$0xff]  ;;  %v192_v31 = vld [vmem:[#allocation7 + $0x20] sm:$0xff]  ;;  %v191_v32 = vld [vmem:[#allocation7 + $0x18] sm:$0xff] }
  0x4a   :  { %273 = vmatpush1.msra.mxu1 %v210_v13  ;;  %v190_v33 = vld [vmem:[#allocation7 + $0x10] sm:$0xff]  ;;  %v189_v34 = vld [vmem:[#allocation7 + $0x8] sm:$0xff]  ;;  %v188_v35 = vld [vmem:[#allocation7] sm:$0xff] }
  0x4b   :  { %274 = vmatprep.subr.mxu1 %v209_v14  ;;  %v251_v36 = vld [vmem:[#allocation7 + $0x1f8] sm:$0xff]  ;;  %v250_v37 = vld [vmem:[#allocation7 + $0x1f0] sm:$0xff]  ;;  %v249_v38 = vld [vmem:[#allocation7 + $0x1e8] sm:$0xff] }
  0x4c   :  { %275 = vmatpush1.msra.mxu1 %v208_v15  ;;  %v248_v39 = vld [vmem:[#allocation7 + $0x1e0] sm:$0xff]  ;;  %v247_v40 = vld [vmem:[#allocation7 + $0x1d8] sm:$0xff]  ;;  %v246_v41 = vld [vmem:[#allocation7 + $0x1d0] sm:$0xff] }
  0x4d   :  { %276 = vmatprep.subr.mxu1 %v207_v16  ;;  %v245_v42 = vld [vmem:[#allocation7 + $0x1c8] sm:$0xff]  ;;  %v244_v43 = vld [vmem:[#allocation7 + $0x1c0] sm:$0xff]  ;;  %v243_v44 = vld [vmem:[#allocation7 + $0x1b8] sm:$0xff] }
  0x4e   :  { %277 = vmatpush1.msra.mxu1 %v206_v17  ;;  %v242_v45 = vld [vmem:[#allocation7 + $0x1b0] sm:$0xff]  ;;  %v241_v46 = vld [vmem:[#allocation7 + $0x1a8] sm:$0xff]  ;;  %v240_v47 = vld [vmem:[#allocation7 + $0x1a0] sm:$0xff] }
  0x4f   :  { %278 = vmatprep.subr.mxu1 %v205_v18  ;;  %v239_v48 = vld [vmem:[#allocation7 + $0x198] sm:$0xff]  ;;  %v238_v49 = vld [vmem:[#allocation7 + $0x190] sm:$0xff]  ;;  %v237_v50 = vld [vmem:[#allocation7 + $0x188] sm:$0xff] }
  0x50   :  { %279 = vmatpush1.msra.mxu1 %v204_v19  ;;  %v236_v51 = vld [vmem:[#allocation7 + $0x180] sm:$0xff]  ;;  %v235_v52 = vld [vmem:[#allocation7 + $0x178] sm:$0xff]  ;;  %v234_v53 = vld [vmem:[#allocation7 + $0x170] sm:$0xff] }
  0x51   :  { %280 = vmatprep.subr.mxu1 %v203_v20  ;;  %v233_v54 = vld [vmem:[#allocation7 + $0x168] sm:$0xff]  ;;  %v232_v55 = vld [vmem:[#allocation7 + $0x160] sm:$0xff]  ;;  %v231_v56 = vld [vmem:[#allocation7 + $0x158] sm:$0xff] }
  0x52   :  { %281 = vmatpush1.msra.mxu1 %v202_v21  ;;  %v230_v57 = vld [vmem:[#allocation7 + $0x150] sm:$0xff]  ;;  %v229_v58 = vld [vmem:[#allocation7 + $0x148] sm:$0xff]  ;;  %v228_v59 = vld [vmem:[#allocation7 + $0x140] sm:$0xff] }
  0x53   :  { %282 = vmatprep.subr.mxu1 %v201_v22  ;;  %v227_v60 = vld [vmem:[#allocation7 + $0x138] sm:$0xff]  ;;  %v226_v61 = vld [vmem:[#allocation7 + $0x130] sm:$0xff]  ;;  %v225_v62 = vld [vmem:[#allocation7 + $0x128] sm:$0xff] }
  0x54   :  { %283 = vmatpush1.msra.mxu1 %v200_v23  ;;  %v224_v63 = vld [vmem:[#allocation7 + $0x120] sm:$0xff]  ;;  %v223_v0 = vld [vmem:[#allocation7 + $0x118] sm:$0xff]  ;;  %v222_v1 = vld [vmem:[#allocation7 + $0x110] sm:$0xff] }
  0x55   :  { %284 = vmatprep.subr.mxu1 %v199_v24  ;;  %v221_v2 = vld [vmem:[#allocation7 + $0x108] sm:$0xff]  ;;  %v220_v3 = vld [vmem:[#allocation7 + $0x100] sm:$0xff]  ;;  %v368_v4 = vld [vmem:[#allocation9 + $0xf8] sm:$0xff] }
  0x56   :  { %285 = vmatpush1.msra.mxu1 %v198_v25  ;;  %v352_v5 = vld [vmem:[#allocation9 + $0x78] sm:$0xff]  ;;  %v367_v6 = vld [vmem:[#allocation9 + $0xf0] sm:$0xff]  ;;  %511 = vmatprep.subr.mxu0 %v368_v4  ;;  %v366_v8 = vld [vmem:[#allocation9 + $0xe8] sm:$0xff] }
  0x57   :  { %286 = vmatprep.subr.mxu1 %v197_v26  ;;  %v351_v7 = vld [vmem:[#allocation9 + $0x70] sm:$0xff]  ;;  %512 = vmatpush3.msra.mxu0 %v352_v5  ;;  %v350_v9 = vld [vmem:[#allocation9 + $0x68] sm:$0xff]  ;;  %v365_v10 = vld [vmem:[#allocation9 + $0xe0] sm:$0xff] }
  0x58   :  { %287 = vmatpush1.msra.mxu1 %v196_v27  ;;  %513 = vmatprep.subr.mxu0 %v367_v6  ;;  %v349_v11 = vld [vmem:[#allocation9 + $0x60] sm:$0xff]  ;;  %v364_v12 = vld [vmem:[#allocation9 + $0xd8] sm:$0xff]  ;;  %v363_v14 = vld [vmem:[#allocation9 + $0xd0] sm:$0xff] }
  0x59   :  { %288 = vmatprep.subr.mxu1 %v195_v28  ;;  %514 = vmatpush3.msra.mxu0 %v351_v7  ;;  %v348_v13 = vld [vmem:[#allocation9 + $0x58] sm:$0xff]  ;;  %v347_v15 = vld [vmem:[#allocation9 + $0x50] sm:$0xff]  ;;  %v362_v16 = vld [vmem:[#allocation9 + $0xc8] sm:$0xff]  ;;  %v101_v28 = vlaneseq }
  0x5a   :  { %289 = vmatpush1.msra.mxu1 %v194_v29  ;;  %515 = vmatprep.subr.mxu0 %v366_v8  ;;  %v346_v17 = vld [vmem:[#allocation9 + $0x48] sm:$0xff]  ;;  %v361_v18 = vld [vmem:[#allocation9 + $0xc0] sm:$0xff]  ;;  %v360_v20 = vld [vmem:[#allocation9 + $0xb8] sm:$0xff] }
  0x5b   :  { %290 = vmatprep.subr.mxu1 %v193_v30  ;;  %516 = vmatpush3.msra.mxu0 %v350_v9  ;;  %v345_v19 = vld [vmem:[#allocation9 + $0x40] sm:$0xff]  ;;  %v344_v21 = vld [vmem:[#allocation9 + $0x38] sm:$0xff]  ;;  %v359_v22 = vld [vmem:[#allocation9 + $0xb0] sm:$0xff]  ;;  %v102_v29 = vshrl.u32 %v101_v28, 7 }
  0x5c   :  { %291 = vmatpush1.msra.mxu1 %v192_v31  ;;  %517 = vmatprep.subr.mxu0 %v365_v10  ;;  %v343_v23 = vld [vmem:[#allocation9 + $0x30] sm:$0xff]  ;;  %v358_v24 = vld [vmem:[#allocation9 + $0xa8] sm:$0xff]  ;;  %v357_v26 = vld [vmem:[#allocation9 + $0xa0] sm:$0xff] }
  0x5d   :  { %292 = vmatprep.subr.mxu1 %v191_v32  ;;  %518 = vmatpush3.msra.mxu0 %v349_v11  ;;  %v342_v25 = vld [vmem:[#allocation9 + $0x28] sm:$0xff]  ;;  %v341_v27 = vld [vmem:[#allocation9 + $0x20] sm:$0xff]  ;;  %v103_v30 = vsub.s32 0, %v102_v29  ;;  %v99_v31 = vld [vmem:[#allocation6] sm:$0x3]  ;;  %v107_v32 = vsub.s32 1, %v102_v29 }
  0x5e   :  { %293 = vmatpush1.msra.mxu1 %v190_v33  ;;  %519 = vmatprep.subr.mxu0 %v364_v12 }
  0x5f   :  { %294 = vmatprep.subr.mxu1 %v189_v34  ;;  %520 = vmatpush3.msra.mxu0 %v348_v13  ;;  %v104_v33 = vrot.slane %v99_v31, %v103_v30  ;;  %v108_v34 = vrot.slane %v99_v31, %v107_v32 }
  0x60   :  { %295 = vmatpush1.msra.mxu1 %v188_v35  ;;  %521 = vmatprep.subr.mxu0 %v363_v14 }
  0x61   :  { %296 = vmatprep.subr.mxu1 %v251_v36  ;;  %522 = vmatpush3.msra.mxu0 %v347_v15 }
  0x62   :  { %297 = vmatpush2.msra.mxu1 %v250_v37  ;;  %523 = vmatprep.subr.mxu0 %v362_v16 }
  0x63   :  { %298 = vmatprep.subr.mxu1 %v249_v38  ;;  %524 = vmatpush3.msra.mxu0 %v346_v17 }
  0x64   :  { %299 = vmatpush2.msra.mxu1 %v248_v39  ;;  %525 = vmatprep.subr.mxu0 %v361_v18 }
  0x65   :  { %300 = vmatprep.subr.mxu1 %v247_v40  ;;  %526 = vmatpush3.msra.mxu0 %v345_v19 }
  0x66   :  { %301 = vmatpush2.msra.mxu1 %v246_v41  ;;  %527 = vmatprep.subr.mxu0 %v360_v20  ;;  %v356_v41 = vld [vmem:[#allocation9 + $0x98] sm:$0xff] }
  0x67   :  { %302 = vmatprep.subr.mxu1 %v245_v42  ;;  %528 = vmatpush3.msra.mxu0 %v344_v21  ;;  %v340_v42 = vld [vmem:[#allocation9 + $0x18] sm:$0xff] }
  0x68   :  { %303 = vmatpush2.msra.mxu1 %v244_v43  ;;  %529 = vmatprep.subr.mxu0 %v359_v22  ;;  %v355_v43 = vld [vmem:[#allocation9 + $0x90] sm:$0xff] }
  0x69   :  { %304 = vmatprep.subr.mxu1 %v243_v44  ;;  %530 = vmatpush3.msra.mxu0 %v343_v23  ;;  %v339_v44 = vld [vmem:[#allocation9 + $0x10] sm:$0xff] }
  0x6a   :  { %305 = vmatpush2.msra.mxu1 %v242_v45  ;;  %531 = vmatprep.subr.mxu0 %v358_v24  ;;  %v354_v45 = vld [vmem:[#allocation9 + $0x88] sm:$0xff] }
  0x6b   :  { %306 = vmatprep.subr.mxu1 %v241_v46  ;;  %532 = vmatpush3.msra.mxu0 %v342_v25  ;;  %v338_v46 = vld [vmem:[#allocation9 + $0x8] sm:$0xff] }
  0x6c   :  { %307 = vmatpush2.msra.mxu1 %v240_v47  ;;  %533 = vmatprep.subr.mxu0 %v357_v26  ;;  %v353_v47 = vld [vmem:[#allocation9 + $0x80] sm:$0xff] }
  0x6d   :  { %308 = vmatprep.subr.mxu1 %v239_v48  ;;  %534 = vmatpush3.msra.mxu0 %v341_v27  ;;  %v337_v48 = vld [vmem:[#allocation9] sm:$0xff] }
  0x6e   :  { %309 = vmatpush2.msra.mxu1 %v238_v49  ;;  %535 = vmatprep.subr.mxu0 %v356_v41  ;;  %v252_v49 = vld [vmem:[%s760_s4] sm:$0x3] }
  0x6f   :  { %310 = vmatprep.subr.mxu1 %v237_v50  ;;  %536 = vmatpush3.msra.mxu0 %v340_v42  ;;  %v257_v50 = vrot.slane %v252_v49, %v103_v30 }
  0x70   :  { %311 = vmatpush2.msra.mxu1 %v236_v51  ;;  %537 = vmatprep.subr.mxu0 %v355_v43  ;;  %v261_v51 = vrot.slane %v252_v49, %v107_v32 }
  0x71   :  { %312 = vmatprep.subr.mxu1 %v235_v52  ;;  %538 = vmatpush3.msra.mxu0 %v339_v44 }
  0x72   :  { %313 = vmatpush2.msra.mxu1 %v234_v53  ;;  %539 = vmatprep.subr.mxu0 %v354_v45 }
  0x73   :  { %314 = vmatprep.subr.mxu1 %v233_v54  ;;  %540 = vmatpush3.msra.mxu0 %v338_v46 }
  0x74   :  { %315 = vmatpush2.msra.mxu1 %v232_v55  ;;  %541 = vmatprep.subr.mxu0 %v353_v47 }
  0x75   :  { %316 = vmatprep.subr.mxu1 %v231_v56  ;;  %542 = vmatpush3.msra.mxu0 %v337_v48 }
  0x76   :  { %317 = vmatpush2.msra.mxu1 %v230_v57 }
  0x77   :  { %318 = vmatprep.subr.mxu1 %v229_v58 }
  0x78   :  { %319 = vmatpush2.msra.mxu1 %v228_v59  ;;  %v508_v59 = vld [vmem:[%s762_s6] ss:$0 sm:$0xff] }
  0x79   :  { %320 = vmatprep.subr.mxu1 %v227_v60 }
  0x7a   :  { %321 = vmatpush2.msra.mxu1 %v226_v61 }
  0x7b   :  { %322 = vmatprep.subr.mxu1 %v225_v62  ;;  %v509_v62 = vld [vmem:[%s763_s7] ss:$0 sm:$0xff] }
  0x7c   :  { %323 = vmatpush2.msra.mxu1 %v224_v63 }
  0x7d   :  { %324 = vmatprep.subr.mxu1 %v223_v0  ;;  %v510_v0 = vld [vmem:[%s764_s8] ss:$0 sm:$0xff] }
  0x7e   :  { %325 = vmatpush2.msra.mxu1 %v222_v1 }
  0x7f   :  { %326 = vmatprep.subr.mxu1 %v221_v2 }
  0x80   :  { %327 = vmatpush2.msra.mxu1 %v220_v3 }
 0x102   :  { %v181_v35 = vpop.f32.mrf.mxu0 }
 0x103   :  { %v182_v36 = vadd.f32 %v181_v35, %v104_v33 }
 0x104   :  { %v183_v37 = vpop.f32.mrf.mxu0 }
 0x105   :  { %v184_v38 = vadd.f32 %v183_v37, %v108_v34  ;;  %v186_v40 = vmax.f32 %v182_v36, 0.0 }
 0x107   :  { %v187_v39 = vmax.f32 %v184_v38, 0.0 }
 0x109   :  { %328 = vmatprep.mubr.f32.mxu1 %v187_v39 }
 0x10a   :  { %329 = vmatmul.mubr.f32.vlgmr.msra.gmra.mxu1 %v186_v40 }
 0x1ca   :  { %v330_v52 = vpop.f32.mrf.mxu1 }
 0x1cb   :  { %v331_v53 = vadd.f32 %v330_v52, %v257_v50 }
 0x1cc   :  { %v332_v54 = vpop.f32.mrf.mxu1 }
 0x1cd   :  { %v333_v55 = vadd.f32 %v332_v54, %v261_v51  ;;  %v335_v57 = vmax.f32 %v331_v53, 0.0 }
 0x1cf   :  { %v336_v56 = vmax.f32 %v333_v55, 0.0 }
 0x1d1   :  { %440 = vmatprep.mubr.f32.mxu0 %v336_v56 }
 0x1d2   :  { %441 = vmatmul.mubr.f32.vlgmr.msra.gmra.mxu0 %v335_v57 }
 0x292   :  { %v543_v58 = vpop.f32.mrf.mxu0 }
 0x294   :  { %v544_v60 = vpop.f32.mrf.mxu0 }
 0x295   :  { %v545_v61 = vadd.f32 %v544_v60, %v543_v58 }
 0x297   :  { %v443_v63 = vadd.f32 %v545_v61, %v508_v59 }
 0x299   :  { %v453_v1 = vmax.f32 %v443_v63, %v509_v62 }
 0x29b   :  { %v461_v2 = vmin.f32 %v453_v1, %v510_v0 }
 0x29d   :  { %462 = vst [vmem:[#allocation10] sm:$0xff] %v461_v2 }
 0x2a4   :  { %v481_v3 = vld [vmem:[#allocation10] sm:$0xf] }
 0x2a5   :  { %482 = vst [vmem:[%s765_s9] sm:$0xf] %v481_v3 }
 0x2a6   :  { %500 = vsyncpa [#allocation3], 1 }
 0x2a7   :  { %501 = vsyncpa [#allocation5], 1 }
 0x2a8   :  { %502 = vsyncpa [#allocation8], 1 }

</bundles_post_ra>
